<compile_context>
chip_gen: v7x
topology: tpu7x:2x2x1
jax: 0.10.0
libtpu: 0.0.40
codegen_flags: <defaults>
</compile_context>

<pallas_src>
import jax
import jax.numpy as jnp
import numpy as np
from jax.experimental import pallas as pl
from jax.experimental.pallas import tpu as pltpu


def outconv_kernel(x_ref, w_ref, b_ref, o_ref):
    # x_ref: (bb, Cin, n_tile)   activation strip, spatial on the lane axis
    # w_ref: (Cout, Cin)         1x1 conv weight (resident across the grid)
    # b_ref: (Cout, 1)           conv bias (broadcast along lanes)
    # o_ref: (bb, Cout, n_tile)
    w = w_ref[...]
    b = b_ref[...]
    # bb is small and static -> unrolled at trace time; each iteration is one
    # lane-dense (Cout, n_tile) matmul + bias add.
    for bi in range(x_ref.shape[0]):
        acc = jnp.dot(
            w, x_ref[bi],
            preferred_element_type=jnp.float32,
            precision=jax.lax.Precision.HIGHEST,
        )
        o_ref[bi] = (acc + b).astype(o_ref.dtype)


def _round_down_multiple(x, m):
    return (x // m) * m


def outconv_forward(x_nchw, weight_oihw, bias, *, io_dtype=None,
                    vmem_step_budget_bytes=12 * 1024 * 1024):
    """Forward of OutConv: 1x1 Conv2d with bias.

    x_nchw:      (B, Cin, H, W), PyTorch layout.
    weight_oihw: (Cout, Cin, 1, 1), PyTorch Conv2d weight layout.
    bias:        (Cout,).
    io_dtype:    optional activation/weight/output dtype (e.g. jnp.bfloat16) for
                 a bandwidth-saving production path; defaults to x's dtype.
    """
    B, Cin, H, W = x_nchw.shape
    Cout = weight_oihw.shape[0]
    HW = H * W

    io_dtype = jnp.dtype(io_dtype) if io_dtype is not None else x_nchw.dtype
    itemsize = io_dtype.itemsize

    # ---- batch folding: fold whole (small) batch into one block --------------
    fold_batch = (B <= 8) and (B * (Cin + Cout) * 1024 * itemsize
                               <= vmem_step_budget_bytes)
    bb = B if fold_batch else 1

    # ---- spatial tile from a per-step byte budget ----------------------------
    # Per step the pipeline double-buffers (in + out) blocks:
    #   2 * bb * (Cin + Cout) * n_tile * itemsize bytes.
    per_lane = bb * (Cin + Cout) * itemsize
    n_budget = max(128, vmem_step_budget_bytes // per_lane)

    if HW >= 128:
        n_tile = min(_round_down_multiple(n_budget, 128),
                     _round_down_multiple(HW, 128))
        n_tile = max(n_tile, 128)
    else:
        n_tile = HW  # tiny spatial extent: full-array block (allowed)
    n_spatial = pl.cdiv(HW, n_tile)

    # Give v7x's second TensorCore something to do when the whole problem would
    # otherwise be a single step, but only if the tile stays big (>=1024 lanes).
    if (B // bb) * n_spatial == 1 and n_tile >= 2048:
        n_tile = _round_down_multiple(n_tile // 2, 128)
        n_spatial = pl.cdiv(HW, n_tile)

    grid = (B // bb, n_spatial)

    # Free reshapes (contiguous NCHW), no transpose / pad glue.
    x2 = x_nchw.reshape(B, Cin, HW).astype(io_dtype)
    w2 = weight_oihw.reshape(Cout, Cin).astype(io_dtype)
    b2 = bias.reshape(Cout, 1).astype(jnp.float32)

    out = pl.pallas_call(
        outconv_kernel,
        out_shape=jax.ShapeDtypeStruct((B, Cout, HW), io_dtype),
        grid_spec=pltpu.PrefetchScalarGridSpec(
            num_scalar_prefetch=0,
            grid=grid,
            in_specs=[
                pl.BlockSpec((bb, Cin, n_tile), lambda b, n: (b, 0, n)),
                pl.BlockSpec((Cout, Cin), lambda b, n: (0, 0)),
                pl.BlockSpec((Cout, 1), lambda b, n: (0, 0)),
            ],
            out_specs=pl.BlockSpec((bb, Cout, n_tile), lambda b, n: (b, 0, n)),
        ),
        compiler_params=pltpu.CompilerParams(
            # Both axes independent -> megacore sharding on v7x (2 TCs); no-op
            # (harmless) on v5e/v6e.
            dimension_semantics=("parallel", "parallel"),
            # Explicit limit: v5e's scoped default is only 16 MiB; 32 MiB is
            # safe on every generation (v7x physical VMEM is 64 MiB) and our
            # double-buffered working set stays under ~24 MiB by construction.
            vmem_limit_bytes=32 * 1024 * 1024,
        ),
    )(x2, w2, b2)

    return out.reshape(B, Cout, H, W)


def _reference(x_nchw, weight_oihw, bias):
    """Plain-JAX reference for nn.Conv2d(kernel_size=1) with bias."""
    y = jax.lax.conv_general_dilated(
        x_nchw, weight_oihw,
        window_strides=(1, 1),
        padding=((0, 0), (0, 0)),
        dimension_numbers=("NCHW", "OIHW", "NCHW"),
    )
    return y + bias.reshape(1, -1, 1, 1)


if __name__ == "__main__":
    # Small shapes consistent with OutConv(in_channels=4, out_channels=8).
    B, Cin, Cout, H, W = 2, 4, 8, 16, 16

    key = jax.random.PRNGKey(0)
    k_x, k_w, k_b = jax.random.split(key, 3)

    x = jax.random.normal(k_x, (B, Cin, H, W), dtype=jnp.float32)
    w = 0.1 * jax.random.normal(k_w, (Cout, Cin, 1, 1), dtype=jnp.float32)
    b = 0.1 * jax.random.normal(k_b, (Cout,), dtype=jnp.float32)

    out = outconv_forward(x, w, b)
    out = jax.block_until_ready(out)

    ref = _reference(x, w, b)
    np.testing.assert_allclose(np.asarray(out), np.asarray(ref), rtol=1e-5, atol=1e-5)

    print("KERNEL_OK")
</pallas_src>

<mosaic_0001>
module attributes {stable_mosaic.version = 11 : i64} {
  func.func @outconv_kernel(%arg0: i32, %arg1: i32, %arg2: memref<2x4x256xf32, #tpu.memory_space<vmem>>, %arg3: memref<8x4xf32, #tpu.memory_space<vmem>>, %arg4: memref<8x1xf32, #tpu.memory_space<vmem>>, %arg5: memref<2x8x256xf32, #tpu.memory_space<vmem>>) attributes {dimension_semantics = [#tpu.dimension_semantics<parallel>, #tpu.dimension_semantics<parallel>], iteration_bounds = array<i64: 1, 1>, scalar_prefetch = 0 : i64, scratch_operands = 0 : i64, tpu.core_type = #tpu.core_type<tc>, window_params = [{transform_indices = @transform_0, window_bounds = array<i64: 2, 4, 256>}, {pipeline_mode = #tpu.pipeline_mode<synchronous>, transform_indices = @transform_1, window_bounds = array<i64: 8, 4>}, {pipeline_mode = #tpu.pipeline_mode<synchronous>, transform_indices = @transform_2, window_bounds = array<i64: 8, 1>}, {transform_indices = @transform_3, window_bounds = array<i64: 2, 8, 256>}]} {
    %c0 = arith.constant 0 : index
    %c0_0 = arith.constant 0 : index
    %0 = vector.load %arg3[%c0, %c0_0] : memref<8x4xf32, #tpu.memory_space<vmem>>, vector<8x4xf32>
    %c0_1 = arith.constant 0 : index
    %c0_2 = arith.constant 0 : index
    %1 = vector.load %arg4[%c0_1, %c0_2] : memref<8x1xf32, #tpu.memory_space<vmem>>, vector<8x1xf32>
    %c0_3 = arith.constant 0 : index
    %c0_4 = arith.constant 0 : index
    %c0_5 = arith.constant 0 : index
    %2 = vector.load %arg2[%c0_3, %c0_4, %c0_5] : memref<2x4x256xf32, #tpu.memory_space<vmem>>, vector<1x4x256xf32>
    %3 = vector.shape_cast %2 : vector<1x4x256xf32> to vector<4x256xf32>
    %cst = arith.constant dense<0.000000e+00> : vector<8x256xf32>
    %4 = tpu.matmul %0, %3, %cst {dimension_numbers = #tpu.dot_dimension_numbers<[1], [0], [0], [1], [0, 0, 1, 1], [], []>, precision = #tpu.contract_precision<fp32>} : vector<8x4xf32>, vector<4x256xf32>, vector<8x256xf32> -> vector<8x256xf32>
    %5 = vector.broadcast %1 : vector<8x1xf32> to vector<8x256xf32>
    %6 = arith.addf %4, %5 : vector<8x256xf32>
    %c0_6 = arith.constant 0 : index
    %c0_7 = arith.constant 0 : index
    %c0_8 = arith.constant 0 : index
    %7 = vector.load %arg5[%c0_6, %c0_7, %c0_8] : memref<2x8x256xf32, #tpu.memory_space<vmem>>, vector<1x8x256xf32>
    %8 = vector.shape_cast %7 : vector<1x8x256xf32> to vector<8x256xf32>
    %9 = vector.shape_cast %6 : vector<8x256xf32> to vector<1x8x256xf32>
    tpu.vector_store %arg5[%c0_6, %c0_7, %c0_8], %9 {strides = array<i32>} : memref<2x8x256xf32, #tpu.memory_space<vmem>>, vector<1x8x256xf32>,
    %c1 = arith.constant 1 : index
    %c0_9 = arith.constant 0 : index
    %c0_10 = arith.constant 0 : index
    %10 = vector.load %arg2[%c1, %c0_9, %c0_10] : memref<2x4x256xf32, #tpu.memory_space<vmem>>, vector<1x4x256xf32>
    %11 = vector.shape_cast %10 : vector<1x4x256xf32> to vector<4x256xf32>
    %cst_11 = arith.constant dense<0.000000e+00> : vector<8x256xf32>
    %12 = tpu.matmul %0, %11, %cst_11 {dimension_numbers = #tpu.dot_dimension_numbers<[1], [0], [0], [1], [0, 0, 1, 1], [], []>, precision = #tpu.contract_precision<fp32>} : vector<8x4xf32>, vector<4x256xf32>, vector<8x256xf32> -> vector<8x256xf32>
    %13 = vector.broadcast %1 : vector<8x1xf32> to vector<8x256xf32>
    %14 = arith.addf %12, %13 : vector<8x256xf32>
    %c1_12 = arith.constant 1 : index
    %c0_13 = arith.constant 0 : index
    %c0_14 = arith.constant 0 : index
    %15 = vector.load %arg5[%c1_12, %c0_13, %c0_14] : memref<2x8x256xf32, #tpu.memory_space<vmem>>, vector<1x8x256xf32>
    %16 = vector.shape_cast %15 : vector<1x8x256xf32> to vector<8x256xf32>
    %17 = vector.shape_cast %14 : vector<8x256xf32> to vector<1x8x256xf32>
    tpu.vector_store %arg5[%c1_12, %c0_13, %c0_14], %17 {strides = array<i32>} : memref<2x8x256xf32, #tpu.memory_space<vmem>>, vector<1x8x256xf32>,
    return
  }
  func.func @transform_0(%arg0: i32, %arg1: i32) -> (i32, i32, i32) {
    %c0_i32 = arith.constant 0 : i32
    %c0_i32_0 = arith.constant 0 : i32
    return %arg0, %c0_i32, %arg1 : i32, i32, i32
  }
  func.func @transform_1(%arg0: i32, %arg1: i32) -> (i32, i32) {
    %c0_i32 = arith.constant 0 : i32
    %c0_i32_0 = arith.constant 0 : i32
    %c0_i32_1 = arith.constant 0 : i32
    return %c0_i32, %c0_i32_0 : i32, i32
  }
  func.func @transform_2(%arg0: i32, %arg1: i32) -> (i32, i32) {
    %c0_i32 = arith.constant 0 : i32
    %c0_i32_0 = arith.constant 0 : i32
    %c0_i32_1 = arith.constant 0 : i32
    return %c0_i32, %c0_i32_0 : i32, i32
  }
  func.func @transform_3(%arg0: i32, %arg1: i32) -> (i32, i32, i32) {
    %c0_i32 = arith.constant 0 : i32
    %c0_i32_0 = arith.constant 0 : i32
    return %arg0, %c0_i32, %arg1 : i32, i32, i32
  }
}

</mosaic_0001>

<bundles_post_ra>
// kernel: tpu_custom_call.1
= control target key start
LH: loop header
LB: loop body
LE: loop exit
PB: predicated region body
PF: predicated region fallthrough
CT: control target
= control target key end

     0   :  { %vm29_vm0 = vcmask 1043456   ;;  %vm25_vm1 = vcmask 31744   ;;  %v1050_v6 = vmov 0.0   ;;  %s1136_s0 = inlined_call_operand.vmem [shape: f32[2,4,256], index: 0, kind: input, shape index: {}]   ;;  %s1137_s1 = inlined_call_operand.vmem [shape: f32[8,4], index: 1, kind: input, shape index: {}]   ;;  %s1138_s2 = inlined_call_operand.vmem [shape: f32[8,1], index: 2, kind: input, shape index: {}]   ;;  %s1139_s3 = inlined_call_operand.hbm [shape: f32[2,8,256], index: 3, kind: output, shape index: {}]  }
   0x1   :  { %v17_v0 = vld [vmem:[%s1136_s0] sm:$0xff]  ;;  %v993_v1 = vld [vmem:[%s1136_s0 + $0x8] sm:$0xff]  ;;  %100 = vmatprep.mubr.f32.mxu0 %v1050_v6  ;;  %575 = vmatprep.mubr.f32.mxu1 %v1050_v6 }
   0x2   :  { %v15_v2 = vld [vmem:[%s1137_s1] sm:$0xff]  ;;  %v24_v3 = vcombine.high %v17_v0, %v17_v0  ;;  %v504_v4 = vcombine.high %v993_v1, %v993_v1  ;;  %v30_v5 = vsel %vm29_vm0, %v17_v0, 0  ;;  %v505_v7 = vsel %vm29_vm0, %v993_v1, 0 }
   0x3   :  { %v16_v8 = vld [vmem:[%s1138_s2] sm:$0xff] }
   0x4   :  { %8 = vsyncpa [#allocation3], 0  ;;  %v1091_v9 = vand.u32 4294901760, %v30_v5  ;;  %v1093_v10 = vand.u32 4294901760, %v505_v7  ;;  %v27_v11 = vsel %vm25_vm1, %v15_v2, 0  ;;  %v32_v12 = vsel %vm29_vm0, %v24_v3, 0 }
   0x5   :  { %v507_v13 = vsel %vm29_vm0, %v504_v4, 0  ;;  %v1097_v14 = vand.u32 4294901760, %v27_v11  ;;  %v1051_v15 = vmov 0   ;;  %v34_v16 = vand.u32 4294901760, %v32_v12  ;;  %s1052_s0 = smov [#allocation2]  }
   0x6   :  { %1023 = vset.pattern.permute.xlu0 %v1051_v15  ;;  %v509_v17 = vand.u32 4294901760, %v507_v13  ;;  %v119_v18 = vsub.f32 %v30_v5, %v1091_v9  ;;  %v594_v19 = vsub.f32 %v505_v7, %v1093_v10  ;;  %s982_s1 = sshll.u32 %s1052_s0, 4  ;;  %s983_s1 = int_to_ptr.vmem [resolvable:$true] %s982_s1 }
   0x7   :  { %20 = vperm.xlu0 %1023, %v16_v8   ;;  %v102_v20 = vsub.f32 %v27_v11, %v1097_v14  ;;  %35 = vmatprep.subr.mxu0 %v34_v16  ;;  %v113_v21 = vsub.f32 %v32_v12, %v34_v16  ;;  %s1026_s2 = scalar_lea.vmem %s983_s1, 512  ;;  %p1031_p1 = scmp.lt.s32.totalorder %s983_s1, %s983_s1 }
   0x8   :  { %510 = vmatprep.subr.mxu1 %v509_v17  ;;  %v588_v22 = vsub.f32 %v507_v13, %v509_v17  ;;  %v120_v23 = vand.u32 4294901760, %v119_v18  ;;  %v595_v24 = vand.u32 4294901760, %v594_v19  ;;  %37 = vmatpush1.msra.mxu0 %v1091_v9  ;;  %p1027_p0 = scmp.ne.s32.totalorder %s983_s1, %s1026_s2  ;;  %p1032_p2 = scmp.lt.s32.totalorder %s1026_s2, %s1026_s2 }
   0x9   :  { %512 = vmatpush1.msra.mxu1 %v1093_v10  ;;  %v103_v25 = vand.u32 4294901760, %v102_v20  ;;  %v114_v26 = vand.u32 4294901760, %v113_v21 }
   0xa   :  { %v589_v27 = vand.u32 4294901760, %v588_v22  ;;  %v121_v28 = vsub.f32 %v119_v18, %v120_v23  ;;  %v596_v29 = vsub.f32 %v594_v19, %v595_v24  ;;  %p1033_p3 = por %p1032_p2, %p1031_p1 }
   0xb   :  { %v104_v30 = vsub.f32 %v102_v20, %v103_v25  ;;  %v115_v31 = vsub.f32 %v113_v21, %v114_v26 }
   0xc   :  { %v590_v32 = vsub.f32 %v588_v22, %v589_v27  ;;  %v122_v34 = vand.u32 4294901760, %v121_v28  ;;  %v597_v35 = vand.u32 4294901760, %v596_v29  ;;  %p1034_p4 = pnand %p1033_p3, %p1027_p0 }
   0xd   :  { %v105_v33 = vand.u32 4294901760, %v104_v30  ;;  %v116_v36 = vand.u32 4294901760, %v115_v31 }
   0xe   :  { %v591_v37 = vand.u32 4294901760, %v590_v32 }
   0xf   :  { %106 = vmatmul.mubr.f32.vlgmr.msra.gmra.mrb[0].mxu0 %v105_v33  ;;  %581 = vmatmul.mubr.f32.vlgmr.msra.gmra.mrb[0].mxu1 %v105_v33 }
  0x10   :  { %117 = vmatprep.subr.mxu0 %v116_v36  ;;  %592 = vmatprep.subr.mxu1 %v591_v37 }
  0x11   :  { %123 = vmatpush1.msra.mxu0 %v122_v34  ;;  %598 = vmatpush1.msra.mxu1 %v597_v35 }
  0x12   :  { %186 = vmatprep.mubr.f32.mxu0 %v1050_v6  ;;  %661 = vmatprep.mubr.f32.mxu1 %v1050_v6 }
  0x13   :  { %196 = vmatprep.subr.mxu0 %v113_v21  ;;  %671 = vmatprep.subr.mxu1 %v588_v22 }
  0x17   :  { %188 = vmatmul.mubr.f32.vlgmr.msra.gmra.mrb[0].mxu0 %v1097_v14  ;;  %663 = vmatmul.mubr.f32.vlgmr.msra.gmra.mrb[0].mxu1 %v1097_v14 }
  0x18   :  { %199 = vmatpush1.msra.mxu0 %v119_v18  ;;  %674 = vmatpush1.msra.mxu1 %v594_v19 }
  0x19   :  { %262 = vmatprep.mubr.f32.mxu0 %v1050_v6  ;;  %737 = vmatprep.mubr.f32.mxu1 %v1050_v6 }
  0x1a   :  { %272 = vmatprep.subr.mxu0 %v34_v16  ;;  %747 = vmatprep.subr.mxu1 %v509_v17 }
  0x1f   :  { %265 = vmatmul.mubr.f32.vlgmr.msra.gmra.mrb[0].mxu0 %v102_v20  ;;  %740 = vmatmul.mubr.f32.vlgmr.msra.gmra.mrb[0].mxu1 %v102_v20 }
  0x20   :  { %274 = vmatpush1.msra.mxu0 %v1091_v9  ;;  %749 = vmatpush1.msra.mxu1 %v1093_v10 }
  0x21   :  { %337 = vmatprep.mubr.f32.mxu0 %v1050_v6  ;;  %812 = vmatprep.mubr.f32.mxu1 %v1050_v6 }
  0x22   :  { %350 = vmatprep.subr.mxu0 %v114_v26  ;;  %825 = vmatprep.subr.mxu1 %v589_v27 }
  0x27   :  { %341 = vmatmul.mubr.f32.vlgmr.msra.gmra.mrb[0].mxu0 %v103_v25  ;;  %816 = vmatmul.mubr.f32.vlgmr.msra.gmra.mrb[0].mxu1 %v103_v25 }
  0x28   :  { %354 = vmatpush1.msra.mxu0 %v120_v23  ;;  %829 = vmatpush1.msra.mxu1 %v595_v24 }
  0x29   :  { %417 = vmatprep.mubr.f32.mxu0 %v1050_v6  ;;  %892 = vmatprep.mubr.f32.mxu1 %v1050_v6 }
  0x2a   :  { %426 = vmatprep.subr.mxu0 %v34_v16  ;;  %901 = vmatprep.subr.mxu1 %v509_v17 }
  0x2f   :  { %419 = vmatmul.mubr.f32.vlgmr.msra.gmra.mrb[0].mxu0 %v1097_v14  ;;  %894 = vmatmul.mubr.f32.vlgmr.msra.gmra.mrb[0].mxu1 %v1097_v14 }
  0x30   :  { %428 = vmatpush1.msra.mxu0 %v1091_v9  ;;  %903 = vmatpush1.msra.mxu1 %v1093_v10 }
  0x31   :  { %491 = vmatprep.mubr.f32.mxu0 %v1050_v6  ;;  %966 = vmatprep.mubr.f32.mxu1 %v1050_v6 }
  0x37   :  { %493 = vmatmul.mubr.f32.vlgmr.msra.gmra.mrb[0].mxu0 %v1097_v14  ;;  %968 = vmatmul.mubr.f32.vlgmr.msra.gmra.mrb[0].mxu1 %v1097_v14 }
  0x86   :  { %v21_v38 = vpop.permute.xlu0 %20 }
 0x10a   :  { %v494_v39 = vpop.f32.mrb[0].mxu0  ;;  %v969_v40 = vpop.f32.mrb[0].mxu1 }
 0x10b   :  { %v994_v41 = vadd.f32 %v494_v39, %v21_v38  ;;  %v996_v42 = vadd.f32 %v969_v40, %v21_v38  ;;  %v496_v43 = vpop.f32.mrb[1].mxu0  ;;  %v971_v44 = vpop.f32.mrb[1].mxu1 }
 0x10c   :  { %v995_v45 = vadd.f32 %v496_v43, %v21_v38  ;;  %v997_v46 = vadd.f32 %v971_v44, %v21_v38 }
 0x10d   :  { %499 = vst [vmem:[#allocation2] sm:$0xff] %v994_v41  ;;  %975 = vst [vmem:[#allocation2 + $0x10] sm:$0xff] %v996_v42 }
 0x10e   :  { %500 = vst [vmem:[#allocation2 + $0x8] sm:$0xff] %v995_v45  ;;  %976 = vst [vmem:[#allocation2 + $0x18] sm:$0xff] %v997_v46 }
 0x10f   :  { %1037 = shalt.err (!%p1034_p4)
}
 0x110   :  { %s1038_s22 = scalar_lea.hbm %s1139_s3, 512 }
 0x111   :  { %p1039_p5 = scmp.ne.s32.totalorder %s1139_s3, %s1038_s22  ;;  %p1042_p6 = scmp.lt.u32.totalorder %s1038_s22, %s1139_s3 }
 0x113   :  { %p1044_p7 = pnand %p1042_p6, %p1039_p5 }
 0x115   :  { %1047 = shalt.err (!%p1044_p7)
}
 0x116   :  { %s1053_s27 = smov 256   ;;  %s1054_s28 = smov 16  }
 0x117   :  { %988 = dma.vmem_to_hbm [thread:$0]  %s983_s1, 512, %s1139_s3, [#allocation3], %s1053_s27, %s1053_s27, %s1054_s28  }
 0x118   :  { %1048 = dma.done.wait [#allocation3], 512  }
 0x119   :  { %1049 = vsyncadd [#allocation3], 4294966784 }
 0x11a   :  { %992 = vsyncpa [#allocation3], 1 }

</bundles_post_ra>
